<compile_context>
chip_gen: v5e
topology: v5e:2x2
jax: 0.10.0
libtpu: 0.0.40
codegen_flags: <defaults>
</compile_context>

<pallas_src>
import jax
import jax.numpy as jnp
from jax.experimental import pallas as pl
from jax.experimental.pallas import tpu as pltpu

_NEG_SLOPE = 0.01          # nn.LeakyReLU default negative_slope
_THICK_NORM = 1.0 / 300.0  # thickness normalisation inside the stand-in fnet


def _leaky_relu(x):
    return jnp.maximum(x, _NEG_SLOPE * x)


def _round_up(n, m):
    return ((n + m - 1) // m) * m


def _block_diag2(a):
    """[[a, 0], [0, a]] — for 2-row lane packing of the tiny weight matrices."""
    r, c = a.shape
    z = jnp.zeros((r, c), a.dtype)
    top = jnp.concatenate([a, z], axis=1)
    bot = jnp.concatenate([z, a], axis=1)
    return jnp.concatenate([top, bot], axis=0)


def _pick_block_rows(rows, bm_req):
    """Row tile: multiple of 8, best-effort even tile count (v7x megacore)."""
    bm = max(8, min(_round_up(bm_req, 8), _round_up(rows, 8)))
    n = pl.cdiv(rows, bm)
    if n > 1 and n % 2 == 1:
        cand = max(8, _round_up(pl.cdiv(rows, n + 1), 8))
        if pl.cdiv(rows, cand) % 2 == 0:
            bm = cand
    return bm


# ----------------------------------------------------------------------------
# fnet(DesignParams): (C, L) thicknesses -> (C, W) spectra.  Tiny (a few KB),
# so it is evaluated in plain XLA (per review) instead of a second pallas_call,
# and its output feeds the weight prep for the fused kernel below.
# ----------------------------------------------------------------------------
def fnet_apply(design_params, fnet_params):
    fw1, fb1, fw2, fb2 = fnet_params
    p = design_params.astype(jnp.float32) * _THICK_NORM
    h = _leaky_relu(p @ fw1.T.astype(jnp.float32) + fb1.astype(jnp.float32))
    return jax.nn.sigmoid(h @ fw2.T.astype(jnp.float32) + fb2.astype(jnp.float32))


# ----------------------------------------------------------------------------
# Fused head: x @ hw^T -> LReLU0 -> Linear1 -> LReLU1 -> Linear2 -> LReLU2.
# x is streamed in row tiles (BlockSpec double-buffers the DMA); every weight /
# bias operand is tiny and stays VMEM-resident across the whole grid.
# ----------------------------------------------------------------------------
def _swnet_kernel(x_ref, hwt_ref, w1t_ref, b1_ref, w2t_ref, b2_ref, o_ref):
    x = x_ref[...].astype(jnp.float32)          # in-kernel cast rides idle VPU slots
    h = _leaky_relu(jnp.dot(x, hwt_ref[...], preferred_element_type=jnp.float32))
    h = _leaky_relu(
        jnp.dot(h, w1t_ref[...], preferred_element_type=jnp.float32) + b1_ref[...]
    )
    h = _leaky_relu(
        jnp.dot(h, w2t_ref[...], preferred_element_type=jnp.float32) + b2_ref[...]
    )
    o_ref[...] = h.astype(o_ref.dtype)


def hybridnet_forward(data_input, design_params, fnet_params, swnet_params, *, tm=2048):
    """Full HybridNet.forward: SWNet(F.linear(data_input, fnet(DesignParams)))."""
    w1, b1, w2, b2 = swnet_params
    hw = fnet_apply(design_params, fnet_params)          # (C, W) hardware weights

    M, W = data_input.shape
    H1, H2 = w1.shape[0], w2.shape[0]
    out_dtype = data_input.dtype

    hwt = hw.T                                           # (W, C), f32, tiny
    w1t = w1.T.astype(jnp.float32)                       # (C, H1)
    b1v = b1.reshape(1, -1).astype(jnp.float32)          # (1, H1)
    w2t = w2.T.astype(jnp.float32)                       # (H1, H2)
    b2v = b2.reshape(1, -1).astype(jnp.float32)          # (1, H2)

    pack = (M % 2 == 0) and (M > 0)
    if pack:
        # Two logical rows per kernel row: lane-dense (…, 2W=128) loads, a full
        # 128-wide MXU contraction, and an unmasked 128-lane output store.
        x = data_input.reshape(M // 2, 2 * W)            # free row-major reshape
        hwt, w1t, w2t = _block_diag2(hwt), _block_diag2(w1t), _block_diag2(w2t)
        b1v = jnp.concatenate([b1v, b1v], axis=1)
        b2v = jnp.concatenate([b2v, b2v], axis=1)
        rows, out_cols = M // 2, 2 * H2
        bm = _pick_block_rows(rows, max(8, tm // 2))
    else:
        x = data_input
        rows, out_cols = M, H2
        bm = _pick_block_rows(rows, tm)

    resident = lambda i: (0, 0)   # small operands: fetched once, stay in VMEM

    out = pl.pallas_call(
        _swnet_kernel,
        out_shape=jax.ShapeDtypeStruct((rows, out_cols), out_dtype),
        grid_spec=pltpu.PrefetchScalarGridSpec(
            num_scalar_prefetch=0,
            grid=(pl.cdiv(rows, bm),),        # partial tail block handled by Pallas
            in_specs=[
                pl.BlockSpec((bm, x.shape[1]), lambda i: (i, 0)),  # streamed rows
                pl.BlockSpec(hwt.shape, resident),   # fnet(DesignParams)^T (blk-diag)
                pl.BlockSpec(w1t.shape, resident),   # SWNet Linear1 weight^T
                pl.BlockSpec(b1v.shape, resident),   # SWNet Linear1 bias
                pl.BlockSpec(w2t.shape, resident),   # SWNet Linear2 weight^T
                pl.BlockSpec(b2v.shape, resident),   # SWNet Linear2 bias
            ],
            out_specs=pl.BlockSpec((bm, out_cols), lambda i: (i, 0)),
        ),
        compiler_params=pltpu.CompilerParams(
            dimension_semantics=("parallel",),       # row split across v7x's 2 TCs
            vmem_limit_bytes=32 * 1024 * 1024,
        ),
    )(x, hwt, w1t, b1v, w2t, b2v)

    return out.reshape(M, H2) if pack else out


# ----------------------------------------------------------------------------
# Pure-JAX reference of the same forward pass.
# ----------------------------------------------------------------------------
def _reference_forward(data_input, design_params, fnet_params, swnet_params):
    fw1, fb1, fw2, fb2 = fnet_params
    w1, b1, w2, b2 = swnet_params
    p = design_params * _THICK_NORM
    h = _leaky_relu(p @ fw1.T + fb1)
    hw = jax.nn.sigmoid(h @ fw2.T + fb2)            # fnet(DesignParams)
    y = _leaky_relu(data_input @ hw.T)              # LReLU0(F.linear(x, hw))
    y = _leaky_relu(y @ w1.T + b1)                  # Linear1 + LReLU1
    y = _leaky_relu(y @ w2.T + b2)                  # Linear2 + LReLU2
    return y


if __name__ == "__main__":
    key = jax.random.PRNGKey(0)
    ks = jax.random.split(key, 10)

    # Small shapes consistent with the module:
    #   data_input : (batch, n_wavelengths) spectra
    #   size       = (batch, n_filters=16, hidden=32, out=64)
    #   DesignParams: (n_filters, tf_layer_num)
    B, W, C, L = 32, 64, 16, 8
    H1, H2 = 32, 64
    FH = 32  # stand-in fnet hidden width

    def uinit(k, shape, fan_in):
        lim = 1.0 / jnp.sqrt(jnp.float32(fan_in))
        return jax.random.uniform(k, shape, jnp.float32, -lim, lim)

    data_input = jax.random.normal(ks[0], (B, W), dtype=jnp.float32)

    thick_min, thick_max = 10.0, 300.0
    design_params = (
        (thick_max - thick_min) * jax.random.uniform(ks[1], (C, L), dtype=jnp.float32)
        + thick_min
    )

    fnet_params = (
        uinit(ks[2], (FH, L), L),   # fnet Linear0 weight
        uinit(ks[3], (FH,), L),     # fnet Linear0 bias
        uinit(ks[4], (W, FH), FH),  # fnet Linear1 weight
        uinit(ks[5], (W,), FH),     # fnet Linear1 bias
    )
    swnet_params = (
        uinit(ks[6], (H1, C), C),   # SWNet Linear1 weight
        uinit(ks[7], (H1,), C),     # SWNet Linear1 bias
        uinit(ks[8], (H2, H1), H1), # SWNet Linear2 weight
        uinit(ks[9], (H2,), H1),    # SWNet Linear2 bias
    )

    fwd = jax.jit(
        lambda x, dp: hybridnet_forward(x, dp, fnet_params, swnet_params)
    )
    out = jax.block_until_ready(fwd(data_input, design_params))

    ref = _reference_forward(data_input, design_params, fnet_params, swnet_params)
    # Loose tolerance: MXU f32 accumulation order differs slightly from XLA's.
    assert out.shape == ref.shape, (out.shape, ref.shape)
    assert jnp.allclose(out, ref, rtol=1e-2, atol=1e-2), float(
        jnp.max(jnp.abs(out - ref))
    )

    print("KERNEL_OK")
</pallas_src>

<mosaic_0001>
module attributes {stable_mosaic.version = 11 : i64} {
  func.func @_swnet_kernel(%arg0: i32, %arg1: memref<16x128xf32, #tpu.memory_space<vmem>>, %arg2: memref<128x32xf32, #tpu.memory_space<vmem>>, %arg3: memref<32x64xf32, #tpu.memory_space<vmem>>, %arg4: memref<1x64xf32, #tpu.memory_space<vmem>>, %arg5: memref<64x128xf32, #tpu.memory_space<vmem>>, %arg6: memref<1x128xf32, #tpu.memory_space<vmem>>, %arg7: memref<16x128xf32, #tpu.memory_space<vmem>>) attributes {dimension_semantics = [#tpu.dimension_semantics<parallel>], iteration_bounds = array<i64: 1>, scalar_prefetch = 0 : i64, scratch_operands = 0 : i64, tpu.core_type = #tpu.core_type<tc>, window_params = [{transform_indices = @transform_0, window_bounds = array<i64: 16, 128>}, {pipeline_mode = #tpu.pipeline_mode<synchronous>, transform_indices = @transform_1, window_bounds = array<i64: 128, 32>}, {pipeline_mode = #tpu.pipeline_mode<synchronous>, transform_indices = @transform_2, window_bounds = array<i64: 32, 64>}, {pipeline_mode = #tpu.pipeline_mode<synchronous>, transform_indices = @transform_3, window_bounds = array<i64: 1, 64>}, {pipeline_mode = #tpu.pipeline_mode<synchronous>, transform_indices = @transform_4, window_bounds = array<i64: 64, 128>}, {pipeline_mode = #tpu.pipeline_mode<synchronous>, transform_indices = @transform_5, window_bounds = array<i64: 1, 128>}, {transform_indices = @transform_6, window_bounds = array<i64: 16, 128>}]} {
    %c0 = arith.constant 0 : index
    %c0_0 = arith.constant 0 : index
    %0 = vector.load %arg1[%c0, %c0_0] : memref<16x128xf32, #tpu.memory_space<vmem>>, vector<16x128xf32>
    %c0_1 = arith.constant 0 : index
    %c0_2 = arith.constant 0 : index
    %1 = vector.load %arg2[%c0_1, %c0_2] : memref<128x32xf32, #tpu.memory_space<vmem>>, vector<128x32xf32>
    %cst = arith.constant dense<0.000000e+00> : vector<16x32xf32>
    %2 = tpu.matmul %0, %1, %cst {dimension_numbers = #tpu.dot_dimension_numbers<[1], [0], [0], [1], [0, 0, 1, 1], [], []>} : vector<16x128xf32>, vector<128x32xf32>, vector<16x32xf32> -> vector<16x32xf32>
    %cst_3 = arith.constant 0.00999999977 : f32
    %3 = vector.broadcast %cst_3 : f32 to vector<16x32xf32>
    %4 = arith.mulf %3, %2 : vector<16x32xf32>
    %5 = arith.maximumf %2, %4 : vector<16x32xf32>
    %c0_4 = arith.constant 0 : index
    %c0_5 = arith.constant 0 : index
    %6 = vector.load %arg3[%c0_4, %c0_5] : memref<32x64xf32, #tpu.memory_space<vmem>>, vector<32x64xf32>
    %cst_6 = arith.constant dense<0.000000e+00> : vector<16x64xf32>
    %7 = tpu.matmul %5, %6, %cst_6 {dimension_numbers = #tpu.dot_dimension_numbers<[1], [0], [0], [1], [0, 0, 1, 1], [], []>} : vector<16x32xf32>, vector<32x64xf32>, vector<16x64xf32> -> vector<16x64xf32>
    %c0_7 = arith.constant 0 : index
    %c0_8 = arith.constant 0 : index
    %8 = vector.load %arg4[%c0_7, %c0_8] : memref<1x64xf32, #tpu.memory_space<vmem>>, vector<1x64xf32>
    %9 = vector.broadcast %8 : vector<1x64xf32> to vector<16x64xf32>
    %10 = arith.addf %7, %9 : vector<16x64xf32>
    %cst_9 = arith.constant 0.00999999977 : f32
    %11 = vector.broadcast %cst_9 : f32 to vector<16x64xf32>
    %12 = arith.mulf %11, %10 : vector<16x64xf32>
    %13 = arith.maximumf %10, %12 : vector<16x64xf32>
    %c0_10 = arith.constant 0 : index
    %c0_11 = arith.constant 0 : index
    %14 = vector.load %arg5[%c0_10, %c0_11] : memref<64x128xf32, #tpu.memory_space<vmem>>, vector<64x128xf32>
    %cst_12 = arith.constant dense<0.000000e+00> : vector<16x128xf32>
    %15 = tpu.matmul %13, %14, %cst_12 {dimension_numbers = #tpu.dot_dimension_numbers<[1], [0], [0], [1], [0, 0, 1, 1], [], []>} : vector<16x64xf32>, vector<64x128xf32>, vector<16x128xf32> -> vector<16x128xf32>
    %c0_13 = arith.constant 0 : index
    %c0_14 = arith.constant 0 : index
    %16 = vector.load %arg6[%c0_13, %c0_14] : memref<1x128xf32, #tpu.memory_space<vmem>>, vector<1x128xf32>
    %17 = vector.broadcast %16 : vector<1x128xf32> to vector<16x128xf32>
    %18 = arith.addf %15, %17 : vector<16x128xf32>
    %cst_15 = arith.constant 0.00999999977 : f32
    %19 = vector.broadcast %cst_15 : f32 to vector<16x128xf32>
    %20 = arith.mulf %19, %18 : vector<16x128xf32>
    %21 = arith.maximumf %18, %20 : vector<16x128xf32>
    %c0_16 = arith.constant 0 : index
    %c0_17 = arith.constant 0 : index
    %22 = vector.load %arg7[%c0_16, %c0_17] : memref<16x128xf32, #tpu.memory_space<vmem>>, vector<16x128xf32>
    tpu.vector_store %arg7[%c0_16, %c0_17], %21 {strides = array<i32>} : memref<16x128xf32, #tpu.memory_space<vmem>>, vector<16x128xf32>,
    return
  }
  func.func @transform_0(%arg0: i32) -> (i32, i32) {
    %c0_i32 = arith.constant 0 : i32
    %c0_i32_0 = arith.constant 0 : i32
    return %arg0, %c0_i32 : i32, i32
  }
  func.func @transform_1(%arg0: i32) -> (i32, i32) {
    %c0_i32 = arith.constant 0 : i32
    %c0_i32_0 = arith.constant 0 : i32
    %c0_i32_1 = arith.constant 0 : i32
    return %c0_i32, %c0_i32_0 : i32, i32
  }
  func.func @transform_2(%arg0: i32) -> (i32, i32) {
    %c0_i32 = arith.constant 0 : i32
    %c0_i32_0 = arith.constant 0 : i32
    %c0_i32_1 = arith.constant 0 : i32
    return %c0_i32, %c0_i32_0 : i32, i32
  }
  func.func @transform_3(%arg0: i32) -> (i32, i32) {
    %c0_i32 = arith.constant 0 : i32
    %c0_i32_0 = arith.constant 0 : i32
    %c0_i32_1 = arith.constant 0 : i32
    return %c0_i32, %c0_i32_0 : i32, i32
  }
  func.func @transform_4(%arg0: i32) -> (i32, i32) {
    %c0_i32 = arith.constant 0 : i32
    %c0_i32_0 = arith.constant 0 : i32
    %c0_i32_1 = arith.constant 0 : i32
    return %c0_i32, %c0_i32_0 : i32, i32
  }
  func.func @transform_5(%arg0: i32) -> (i32, i32) {
    %c0_i32 = arith.constant 0 : i32
    %c0_i32_0 = arith.constant 0 : i32
    %c0_i32_1 = arith.constant 0 : i32
    return %c0_i32, %c0_i32_0 : i32, i32
  }
  func.func @transform_6(%arg0: i32) -> (i32, i32) {
    %c0_i32 = arith.constant 0 : i32
    %c0_i32_0 = arith.constant 0 : i32
    return %arg0, %c0_i32 : i32, i32
  }
}

</mosaic_0001>

<bundles_post_ra>
// kernel: _lambda_.1
= control target key start
LH: loop header
LB: loop body
LE: loop exit
PB: predicated region body
PF: predicated region fallthrough
CT: control target
= control target key end

     0   :  { %vm76_vm0 = vcmask 261120   ;;  %vm122_vm1 = vcmask 523264   ;;  %s321_s1 = inlined_call_operand.vmem [shape: f32[128,32], index: 1, kind: input, shape index: {}]   ;;  %s322_s2 = inlined_call_operand.vmem [shape: f32[32,64], index: 2, kind: input, shape index: {}]   ;;  %s323_s0 = inlined_call_operand.vmem [shape: f32[16,128], index: 0, kind: input, shape index: {}]   ;;  %s324_s3 = inlined_call_operand.vmem [shape: f32[1,64], index: 3, kind: input, shape index: {}]   ;;  %s325_s4 = inlined_call_operand.vmem [shape: f32[64,128], index: 4, kind: input, shape index: {}]   ;;  %s326_s5 = inlined_call_operand.vmem [shape: f32[1,128], index: 5, kind: input, shape index: {}]   ;;  %s327_s6 = inlined_call_operand.vmem [shape: f32[16,128], index: 6, kind: output, shape index: {}]  }
   0x1   :  { %v40_v0 = vld [vmem:[%s321_s1 + $0x78] sm:$0xff]  ;;  %v39_v1 = vld [vmem:[%s321_s1 + $0x70] sm:$0xff]  ;;  %v38_v2 = vld [vmem:[%s321_s1 + $0x68] sm:$0xff] }
   0x2   :  { %41 = vmatpush.msra.mxu0 %v40_v0  ;;  %166 = vmatpush.msra.mxu3 %v40_v0  ;;  %v37_v3 = vld [vmem:[%s321_s1 + $0x60] sm:$0xff]  ;;  %v36_v4 = vld [vmem:[%s321_s1 + $0x58] sm:$0xff]  ;;  %v35_v6 = vld [vmem:[%s321_s1 + $0x50] sm:$0xff] }
   0x3   :  { %v71_v5 = vld [vmem:[%s322_s2 + $0x18] sm:$0xff]  ;;  %v34_v7 = vld [vmem:[%s321_s1 + $0x48] sm:$0xff]  ;;  %v33_v8 = vld [vmem:[%s321_s1 + $0x40] sm:$0xff] }
   0x4   :  { %42 = vmatpush.msra.mxu0 %v39_v1  ;;  %167 = vmatpush.msra.mxu3 %v39_v1  ;;  %v32_v9 = vld [vmem:[%s321_s1 + $0x38] sm:$0xff]  ;;  %v31_v10 = vld [vmem:[%s321_s1 + $0x30] sm:$0xff]  ;;  %v30_v11 = vld [vmem:[%s321_s1 + $0x28] sm:$0xff] }
   0x5   :  { %95 = vmatpush.msra.mxu1 %v71_v5  ;;  %v29_v12 = vld [vmem:[%s321_s1 + $0x20] sm:$0xff]  ;;  %v28_v13 = vld [vmem:[%s321_s1 + $0x18] sm:$0xff]  ;;  %v27_v14 = vld [vmem:[%s321_s1 + $0x10] sm:$0xff] }
   0x6   :  { %43 = vmatpush.msra.mxu0 %v38_v2  ;;  %168 = vmatpush.msra.mxu3 %v38_v2  ;;  %v26_v15 = vld [vmem:[%s321_s1 + $0x8] sm:$0xff]  ;;  %v25_v16 = vld [vmem:[%s321_s1] sm:$0xff]  ;;  %v70_v19 = vld [vmem:[%s322_s2 + $0x10] sm:$0xff] }
   0x7   :  { %v23_v17 = vld [vmem:[%s323_s0] sm:$0xff]  ;;  %v24_v18 = vld [vmem:[%s323_s0 + $0x8] sm:$0xff]  ;;  %96 = vmatpush.msra.mxu1 %v70_v19  ;;  %v117_v22 = vld [vmem:[%s325_s4 + $0x38] sm:$0xff] }
   0x8   :  { %44 = vmatpush.msra.mxu0 %v37_v3  ;;  %169 = vmatpush.msra.mxu3 %v37_v3  ;;  %v69_v20 = vld [vmem:[%s322_s2 + $0x8] sm:$0xff]  ;;  %v68_v21 = vld [vmem:[%s322_s2] sm:$0xff]  ;;  %v116_v23 = vld [vmem:[%s325_s4 + $0x30] sm:$0xff] }
   0x9   :  { %97 = vmatpush.msra.mxu1 %v69_v20  ;;  %137 = vmatpush.msra.mxu2 %v117_v22  ;;  %v115_v24 = vld [vmem:[%s325_s4 + $0x28] sm:$0xff]  ;;  %v114_v25 = vld [vmem:[%s325_s4 + $0x20] sm:$0xff]  ;;  %v113_v32 = vld [vmem:[%s325_s4 + $0x18] sm:$0xff] }
   0xa   :  { %45 = vmatpush.msra.mxu0 %v36_v4  ;;  %170 = vmatpush.msra.mxu3 %v36_v4  ;;  %v112_v33 = vld [vmem:[%s325_s4 + $0x10] sm:$0xff]  ;;  %v111_v34 = vld [vmem:[%s325_s4 + $0x8] sm:$0xff]  ;;  %v110_v35 = vld [vmem:[%s325_s4] sm:$0xff] }
   0xb   :  { %98 = vmatpush.msra.mxu1 %v68_v21  ;;  %138 = vmatpush.msra.mxu2 %v116_v23  ;;  %v182_v36 = vld [vmem:[%s324_s3] ss:$0 sm:$0xff] }
   0xc   :  { %46 = vmatpush.msra.mxu0 %v35_v6  ;;  %171 = vmatpush.msra.mxu3 %v35_v6  ;;  %v183_v45 = vld [vmem:[%s326_s5] ss:$0 sm:$0xff] }
   0xd   :  { %139 = vmatpush.msra.mxu2 %v115_v24 }
   0xe   :  { %47 = vmatpush.msra.mxu0 %v34_v7  ;;  %172 = vmatpush.msra.mxu3 %v34_v7 }
   0xf   :  { %140 = vmatpush.msra.mxu2 %v114_v25 }
  0x10   :  { %48 = vmatpush.msra.mxu0 %v33_v8  ;;  %173 = vmatpush.msra.mxu3 %v33_v8 }
  0x11   :  { %141 = vmatpush.msra.mxu2 %v113_v32 }
  0x12   :  { %49 = vmatpush.msra.mxu0 %v32_v9  ;;  %174 = vmatpush.msra.mxu3 %v32_v9 }
  0x13   :  { %142 = vmatpush.msra.mxu2 %v112_v33 }
  0x14   :  { %50 = vmatpush.msra.mxu0 %v31_v10  ;;  %175 = vmatpush.msra.mxu3 %v31_v10 }
  0x15   :  { %143 = vmatpush.msra.mxu2 %v111_v34 }
  0x16   :  { %51 = vmatpush.msra.mxu0 %v30_v11  ;;  %176 = vmatpush.msra.mxu3 %v30_v11 }
  0x17   :  { %144 = vmatpush.msra.mxu2 %v110_v35 }
  0x18   :  { %52 = vmatpush.msra.mxu0 %v29_v12  ;;  %177 = vmatpush.msra.mxu3 %v29_v12 }
  0x1a   :  { %53 = vmatpush.msra.mxu0 %v28_v13  ;;  %178 = vmatpush.msra.mxu3 %v28_v13 }
  0x1c   :  { %54 = vmatpush.msra.mxu0 %v27_v14  ;;  %179 = vmatpush.msra.mxu3 %v27_v14 }
  0x1e   :  { %55 = vmatpush.msra.mxu0 %v26_v15  ;;  %180 = vmatpush.msra.mxu3 %v26_v15 }
  0x20   :  { %56 = vmatpush.msra.mxu0 %v25_v16  ;;  %181 = vmatpush.msra.mxu3 %v25_v16 }
  0x21   :  { %57 = vmatmul.f32.vlgmr.msra.gmra.mxu0 %v23_v17  ;;  %60 = vmatmul.f32.vlgmr.msra.gmra.mxu3 %v24_v18 }
  0x9e   :  { %v58_v26 = vpop.f32.mrf.mxu0 }
  0x9f   :  { %v64_v27 = vmul.f32 0.01, %v58_v26 }
  0xa1   :  { %v66_v28 = vmax.f32 %v58_v26, %v64_v27 }
  0xa3   :  { %162 = vmatmul.msk.f32.vlgmr.msra.gmra.mxu1 %vm76_vm0, %v66_v28 }
  0xa4   :  { %v61_v29 = vpop.f32.mrf.mxu3 }
  0xa5   :  { %v65_v30 = vmul.f32 0.01, %v61_v29 }
  0xa7   :  { %v67_v31 = vmax.f32 %v61_v29, %v65_v30 }
  0xab   :  { %163 = vmatmul.msk.f32.gmra.mxu1 %vm76_vm0, %v67_v31 }
 0x120   :  { %v100_v37 = vpop.f32.mrf.mxu1 }
 0x121   :  { %v101_v38 = vadd.f32 %v182_v36, %v100_v37 }
 0x123   :  { %v106_v39 = vmul.f32 0.01, %v101_v38 }
 0x125   :  { %v108_v40 = vmax.f32 %v101_v38, %v106_v39 }
 0x127   :  { %164 = vmatmul.msk.f32.vlgmr.msra.gmra.mxu2 %vm122_vm1, %v108_v40 }
 0x128   :  { %v103_v41 = vpop.f32.mrf.mxu1 }
 0x129   :  { %v104_v42 = vadd.f32 %v182_v36, %v103_v41 }
 0x12b   :  { %v107_v43 = vmul.f32 0.01, %v104_v42 }
 0x12d   :  { %v109_v44 = vmax.f32 %v104_v42, %v107_v43 }
 0x12f   :  { %165 = vmatmul.msk.f32.gmra.mxu2 %vm122_vm1, %v109_v44 }
 0x1aa   :  { %v146_v46 = vpop.f32.mrf.mxu2 }
 0x1ab   :  { %v147_v47 = vadd.f32 %v183_v45, %v146_v46 }
 0x1ad   :  { %v152_v48 = vmul.f32 0.01, %v147_v47 }
 0x1af   :  { %v154_v49 = vmax.f32 %v147_v47, %v152_v48 }
 0x1b1   :  { %156 = vst [vmem:[%s327_s6] sm:$0xff] %v154_v49 }
 0x1b2   :  { %v149_v50 = vpop.f32.mrf.mxu2 }
 0x1b3   :  { %v150_v51 = vadd.f32 %v183_v45, %v149_v50 }
 0x1b5   :  { %v153_v52 = vmul.f32 0.01, %v150_v51 }
 0x1b7   :  { %v155_v53 = vmax.f32 %v150_v51, %v153_v52 }
 0x1b9   :  { %157 = vst [vmem:[%s327_s6 + $0x8] sm:$0xff] %v155_v53 }

</bundles_post_ra>
